<compile_context>
chip_gen: v7x
topology: tpu7x:2x2x1
jax: 0.10.0
libtpu: 0.0.40
codegen_flags: <defaults>
</compile_context>

<pallas_src>
import math

import jax
import jax.numpy as jnp
from jax.experimental import pallas as pl
from jax.experimental.pallas import tpu as pltpu


def _round_up(n, m):
    return ((n + m - 1) // m) * m


def _cdiv(a, b):
    return -(-a // b)


def _default_block_width():
    """128-wide weight blocks on v5e and older, 256-wide on v6e/v7x (2x256^2 MXU)."""
    try:
        kind = jax.devices()[0].device_kind.lower()
    except Exception:
        return 128
    if "v6" in kind or "v7" in kind:
        return 256
    return 128


# ---------------------------------------------------------------------------
# Kernel
# ---------------------------------------------------------------------------

def brain_kernel(x_ref,
                 w1_ref, b1_ref,
                 w2_ref, b2_ref,
                 w3_ref, b3_ref,
                 w4_ref, b4_ref,
                 o_ref):
    """One packed batch tile through the fused 4-layer MLP.

    Matmuls run on the MXU in the weights' operand dtype (x is cast in-kernel)
    with f32 accumulation; bias-add / ReLU stay in f32 on the VPU.
    """
    dot_dtype = w1_ref.dtype

    x = x_ref[...].astype(dot_dtype)            # in-kernel cast (no wrapper HBM pass)
    h = jnp.dot(x, w1_ref[...], preferred_element_type=jnp.float32)
    h = jnp.maximum(h + b1_ref[...], 0.0)

    h = jnp.dot(h.astype(dot_dtype), w2_ref[...],
                preferred_element_type=jnp.float32)
    h = jnp.maximum(h + b2_ref[...], 0.0)

    h = jnp.dot(h.astype(dot_dtype), w3_ref[...],
                preferred_element_type=jnp.float32)
    h = jnp.maximum(h + b3_ref[...], 0.0)

    out = jnp.dot(h.astype(dot_dtype), w4_ref[...],
                  preferred_element_type=jnp.float32)
    o_ref[...] = (out + b4_ref[...]).astype(o_ref.dtype)


# ---------------------------------------------------------------------------
# Parameter construction / packing
# ---------------------------------------------------------------------------

def init_brain_params(key, input_size, hidden_size, output_size):
    """nn.Linear-style init (uniform +/- 1/sqrt(fan_in)).

    Weights stored pre-transposed as [in, out]; biases as [1, out].
    """
    sizes = [(input_size, hidden_size),
             (hidden_size, hidden_size),
             (hidden_size, hidden_size),
             (hidden_size, output_size)]
    params = {}
    for i, (fan_in, fan_out) in enumerate(sizes, start=1):
        key, kw, kb = jax.random.split(key, 3)
        bound = 1.0 / math.sqrt(fan_in)
        params[f"w{i}"] = jax.random.uniform(
            kw, (fan_in, fan_out), jnp.float32, minval=-bound, maxval=bound)
        params[f"b{i}"] = jax.random.uniform(
            kb, (1, fan_out), jnp.float32, minval=-bound, maxval=bound)
    return params


def pack_brain_params(params, *, block_width=None, operand_dtype=jnp.bfloat16):
    """Build block-diagonal weights that process `pack` logical rows per lane row.

    Layout per packed row (pack = P groups):
      input  lanes: group p occupies [p*input_size, (p+1)*input_size)
      hidden lanes: group p occupies [p*g_h, p*g_h + hidden)   (g_h >= hidden)
      output lanes: group p occupies [p*g_out, p*g_out + output)
    Off-diagonal weight blocks and padded lanes are zero, so groups never mix
    and padded hidden lanes stay exactly zero through the ReLU layers.
    Weights are cast to `operand_dtype` (bf16 is MXU-native on v5e/v6e/v7x);
    biases stay f32.
    """
    if block_width is None:
        block_width = _default_block_width()

    w1, b1 = params["w1"], params["b1"]
    w2, b2 = params["w2"], params["b2"]
    w3, b3 = params["w3"], params["b3"]
    w4, b4 = params["w4"], params["b4"]
    input_size, hidden = w1.shape
    output = w4.shape[1]

    if hidden >= block_width:
        pack = 1
        g_h = _round_up(hidden, 128)
        g_out = _round_up(output, 128)
    else:
        pack = block_width // hidden
        g_h = block_width // pack                       # P * g_h == block_width
        g_out = (_round_up(output, 128 // pack)
                 if 128 % pack == 0 else output)        # P * g_out lane-dense

    def blockdiag(w, r_stride, c_stride):
        rr, cc = w.shape
        out = jnp.zeros((pack * r_stride, pack * c_stride), jnp.float32)
        for p in range(pack):
            out = out.at[p * r_stride:p * r_stride + rr,
                         p * c_stride:p * c_stride + cc].set(w)
        return out

    def tilebias(b, c_stride):
        cc = b.shape[-1]
        out = jnp.zeros((1, pack * c_stride), jnp.float32)
        for p in range(pack):
            out = out.at[:, p * c_stride:p * c_stride + cc].set(b)
        return out

    packed = {
        "w1": blockdiag(w1, input_size, g_h).astype(operand_dtype),
        "b1": tilebias(b1, g_h),
        "w2": blockdiag(w2, g_h, g_h).astype(operand_dtype),
        "b2": tilebias(b2, g_h),
        "w3": blockdiag(w3, g_h, g_h).astype(operand_dtype),
        "b3": tilebias(b3, g_h),
        "w4": blockdiag(w4, g_h, g_out).astype(operand_dtype),
        "b4": tilebias(b4, g_out),
    }
    meta = {"pack": pack, "g_out": g_out,
            "input_size": input_size, "output_size": output}
    return packed, meta


# ---------------------------------------------------------------------------
# Forward wrapper
# ---------------------------------------------------------------------------

_MIN_SPLIT_ROWS = 256  # only split a single-step grid when each half has real work


def _choose_tile(rows, sub, block_rows):
    tb = min(block_rows, _round_up(max(rows, 1), sub))
    tb = _round_up(max(tb, sub), sub)
    # If everything fits in a single grid step but there is plenty of work,
    # split it in two so both v7x TensorCores participate.
    if rows <= tb and rows >= _MIN_SPLIT_ROWS:
        tb = _round_up(_cdiv(rows, 2), sub)
    return tb


def brain_forward(x, packed_params, meta, *, block_batch=4096):
    """x: [B, input_size] f32; packed_params/meta from pack_brain_params()."""
    B, in_size = x.shape
    pack = meta["pack"]
    g_out = meta["g_out"]
    output_size = meta["output_size"]
    assert in_size == meta["input_size"]

    w1, b1 = packed_params["w1"], packed_params["b1"]
    w2, b2 = packed_params["w2"], packed_params["b2"]
    w3, b3 = packed_params["w3"], packed_params["b3"]
    w4, b4 = packed_params["w4"], packed_params["b4"]
    inp = w1.shape[0]            # pack * input_size
    hp = w1.shape[1]             # packed hidden width
    op = w4.shape[1]             # packed output width (pack * g_out)
    operand_dtype = w1.dtype

    sub = 16 if operand_dtype == jnp.bfloat16 else 8
    rows = _cdiv(B, pack)                             # packed rows of real data
    block_rows = max(sub, block_batch // pack)        # packed rows per grid step
    tb = _choose_tile(rows, sub, block_rows)
    rows_pad = _round_up(max(rows, 1), tb)
    b_pad = rows_pad * pack

    x_p = x if b_pad == B else jnp.pad(x, ((0, b_pad - B), (0, 0)))
    x_packed = x_p.reshape(rows_pad, inp)             # free, contiguity-preserving

    grid = (rows_pad // tb,)

    def full(arr):
        # Whole-array block with a constant index_map: VMEM-resident across steps.
        return pl.BlockSpec(arr.shape, lambda i: (0, 0))

    param_bytes = sum(int(a.size) * a.dtype.itemsize
                      for a in (w1, b1, w2, b2, w3, b3, w4, b4))
    flops = 2 * rows_pad * (inp * hp + 2 * hp * hp + hp * op)
    bytes_accessed = (int(x_packed.size) * x_packed.dtype.itemsize
                      + rows_pad * op * 4
                      + param_bytes)

    # Only raise the scoped-VMEM limit if the double-buffered tiles + params
    # could exceed the v5e 16 MiB default.
    in_tile = tb * inp * x_packed.dtype.itemsize
    out_tile = tb * op * 4
    vmem_est = 2 * (in_tile + out_tile + param_bytes) + (2 << 20)
    vmem_limit = int(min(vmem_est * 2, 64 << 20)) if vmem_est > (12 << 20) else None

    out_packed = pl.pallas_call(
        brain_kernel,
        out_shape=jax.ShapeDtypeStruct((rows_pad, op), jnp.float32),
        grid=grid,
        in_specs=[
            pl.BlockSpec((tb, inp), lambda i: (i, 0)),
            full(w1), full(b1),
            full(w2), full(b2),
            full(w3), full(b3),
            full(w4), full(b4),
        ],
        out_specs=pl.BlockSpec((tb, op), lambda i: (i, 0)),
        compiler_params=pltpu.CompilerParams(
            dimension_semantics=("parallel",),
            vmem_limit_bytes=vmem_limit),
        cost_estimate=pl.CostEstimate(
            flops=flops, transcendentals=0, bytes_accessed=bytes_accessed),
    )(x_packed, w1, b1, w2, b2, w3, b3, w4, b4)

    # Free unpack: [rows_pad, pack*g_out] -> [rows_pad*pack, g_out] -> real slice.
    out = out_packed.reshape(rows_pad * pack, g_out)
    return out[:B, :output_size]


def brain_forward_ref(x, params):
    """Plain-JAX reference for correctness checking (un-packed params)."""
    h = jnp.maximum(x @ params["w1"] + params["b1"], 0.0)
    h = jnp.maximum(h @ params["w2"] + params["b2"], 0.0)
    h = jnp.maximum(h @ params["w3"] + params["b3"], 0.0)
    return h @ params["w4"] + params["b4"]


if __name__ == "__main__":
    # Tic-tac-toe Brain: input = 9 board cells, hidden = 32, output = 9 moves.
    input_size, hidden_size, output_size = 9, 32, 9

    key = jax.random.PRNGKey(0)
    key, kx1, kx2 = jax.random.split(key, 3)
    params = init_brain_params(key, input_size, hidden_size, output_size)

    x_small = jax.random.normal(kx1, (2, input_size), jnp.float32)
    # A batch that is not a multiple of the pack factor, to exercise packing/padding.
    x_odd = jax.random.normal(kx2, (37, input_size), jnp.float32)

    # f32 MXU operands: bit-accurate path, tight tolerance.
    packed_f32, meta_f32 = pack_brain_params(params, operand_dtype=jnp.float32)
    for xt in (x_small, x_odd):
        ref = brain_forward_ref(xt, params)
        out = jax.block_until_ready(brain_forward(xt, packed_f32, meta_f32))
        assert out.shape == ref.shape
        assert jnp.allclose(out, ref, atol=1e-5, rtol=1e-5)

    # bf16 MXU operands (default; MXU-native on v5e/v6e/v7x): f32 accumulate,
    # f32 bias/ReLU on the VPU.
    packed_bf16, meta_bf16 = pack_brain_params(params)
    ref = brain_forward_ref(x_small, params)
    out_bf16 = jax.block_until_ready(brain_forward(x_small, packed_bf16, meta_bf16))
    assert out_bf16.shape == ref.shape
    assert jnp.allclose(out_bf16, ref, atol=5e-2, rtol=5e-2)

    print("KERNEL_OK")
</pallas_src>

<mosaic_0001>
module attributes {stable_mosaic.version = 11 : i64} {
  func.func @brain_kernel(%arg0: i32, %arg1: memref<8x36xf32, #tpu.memory_space<vmem>>, %arg2: memref<36x128xf32, #tpu.memory_space<vmem>>, %arg3: memref<1x128xf32, #tpu.memory_space<vmem>>, %arg4: memref<128x128xf32, #tpu.memory_space<vmem>>, %arg5: memref<1x128xf32, #tpu.memory_space<vmem>>, %arg6: memref<128x128xf32, #tpu.memory_space<vmem>>, %arg7: memref<1x128xf32, #tpu.memory_space<vmem>>, %arg8: memref<128x128xf32, #tpu.memory_space<vmem>>, %arg9: memref<1x128xf32, #tpu.memory_space<vmem>>, %arg10: memref<8x128xf32, #tpu.memory_space<vmem>>) attributes {dimension_semantics = [#tpu.dimension_semantics<parallel>], iteration_bounds = array<i64: 1>, scalar_prefetch = 0 : i64, scratch_operands = 0 : i64, tpu.core_type = #tpu.core_type<tc>, window_params = [{transform_indices = @transform_0, window_bounds = array<i64: 8, 36>}, {pipeline_mode = #tpu.pipeline_mode<synchronous>, transform_indices = @transform_1, window_bounds = array<i64: 36, 128>}, {pipeline_mode = #tpu.pipeline_mode<synchronous>, transform_indices = @transform_2, window_bounds = array<i64: 1, 128>}, {pipeline_mode = #tpu.pipeline_mode<synchronous>, transform_indices = @transform_3, window_bounds = array<i64: 128, 128>}, {pipeline_mode = #tpu.pipeline_mode<synchronous>, transform_indices = @transform_4, window_bounds = array<i64: 1, 128>}, {pipeline_mode = #tpu.pipeline_mode<synchronous>, transform_indices = @transform_5, window_bounds = array<i64: 128, 128>}, {pipeline_mode = #tpu.pipeline_mode<synchronous>, transform_indices = @transform_6, window_bounds = array<i64: 1, 128>}, {pipeline_mode = #tpu.pipeline_mode<synchronous>, transform_indices = @transform_7, window_bounds = array<i64: 128, 128>}, {pipeline_mode = #tpu.pipeline_mode<synchronous>, transform_indices = @transform_8, window_bounds = array<i64: 1, 128>}, {transform_indices = @transform_9, window_bounds = array<i64: 8, 128>}]} {
    %c0 = arith.constant 0 : index
    %c0_0 = arith.constant 0 : index
    %0 = vector.load %arg1[%c0, %c0_0] : memref<8x36xf32, #tpu.memory_space<vmem>>, vector<8x36xf32>
    %c0_1 = arith.constant 0 : index
    %c0_2 = arith.constant 0 : index
    %1 = vector.load %arg2[%c0_1, %c0_2] : memref<36x128xf32, #tpu.memory_space<vmem>>, vector<36x128xf32>
    %cst = arith.constant dense<0.000000e+00> : vector<8x128xf32>
    %2 = tpu.matmul %0, %1, %cst {dimension_numbers = #tpu.dot_dimension_numbers<[1], [0], [0], [1], [0, 0, 1, 1], [], []>} : vector<8x36xf32>, vector<36x128xf32>, vector<8x128xf32> -> vector<8x128xf32>
    %c0_3 = arith.constant 0 : index
    %c0_4 = arith.constant 0 : index
    %3 = vector.load %arg3[%c0_3, %c0_4] : memref<1x128xf32, #tpu.memory_space<vmem>>, vector<1x128xf32>
    %4 = vector.broadcast %3 : vector<1x128xf32> to vector<8x128xf32>
    %5 = arith.addf %2, %4 : vector<8x128xf32>
    %cst_5 = arith.constant 0.000000e+00 : f32
    %6 = vector.broadcast %cst_5 : f32 to vector<8x128xf32>
    %7 = arith.maximumf %5, %6 : vector<8x128xf32>
    %c0_6 = arith.constant 0 : index
    %c0_7 = arith.constant 0 : index
    %8 = vector.load %arg4[%c0_6, %c0_7] : memref<128x128xf32, #tpu.memory_space<vmem>>, vector<128x128xf32>
    %cst_8 = arith.constant dense<0.000000e+00> : vector<8x128xf32>
    %9 = tpu.matmul %7, %8, %cst_8 {dimension_numbers = #tpu.dot_dimension_numbers<[1], [0], [0], [1], [0, 0, 1, 1], [], []>} : vector<8x128xf32>, vector<128x128xf32>, vector<8x128xf32> -> vector<8x128xf32>
    %c0_9 = arith.constant 0 : index
    %c0_10 = arith.constant 0 : index
    %10 = vector.load %arg5[%c0_9, %c0_10] : memref<1x128xf32, #tpu.memory_space<vmem>>, vector<1x128xf32>
    %11 = vector.broadcast %10 : vector<1x128xf32> to vector<8x128xf32>
    %12 = arith.addf %9, %11 : vector<8x128xf32>
    %cst_11 = arith.constant 0.000000e+00 : f32
    %13 = vector.broadcast %cst_11 : f32 to vector<8x128xf32>
    %14 = arith.maximumf %12, %13 : vector<8x128xf32>
    %c0_12 = arith.constant 0 : index
    %c0_13 = arith.constant 0 : index
    %15 = vector.load %arg6[%c0_12, %c0_13] : memref<128x128xf32, #tpu.memory_space<vmem>>, vector<128x128xf32>
    %cst_14 = arith.constant dense<0.000000e+00> : vector<8x128xf32>
    %16 = tpu.matmul %14, %15, %cst_14 {dimension_numbers = #tpu.dot_dimension_numbers<[1], [0], [0], [1], [0, 0, 1, 1], [], []>} : vector<8x128xf32>, vector<128x128xf32>, vector<8x128xf32> -> vector<8x128xf32>
    %c0_15 = arith.constant 0 : index
    %c0_16 = arith.constant 0 : index
    %17 = vector.load %arg7[%c0_15, %c0_16] : memref<1x128xf32, #tpu.memory_space<vmem>>, vector<1x128xf32>
    %18 = vector.broadcast %17 : vector<1x128xf32> to vector<8x128xf32>
    %19 = arith.addf %16, %18 : vector<8x128xf32>
    %cst_17 = arith.constant 0.000000e+00 : f32
    %20 = vector.broadcast %cst_17 : f32 to vector<8x128xf32>
    %21 = arith.maximumf %19, %20 : vector<8x128xf32>
    %c0_18 = arith.constant 0 : index
    %c0_19 = arith.constant 0 : index
    %22 = vector.load %arg8[%c0_18, %c0_19] : memref<128x128xf32, #tpu.memory_space<vmem>>, vector<128x128xf32>
    %cst_20 = arith.constant dense<0.000000e+00> : vector<8x128xf32>
    %23 = tpu.matmul %21, %22, %cst_20 {dimension_numbers = #tpu.dot_dimension_numbers<[1], [0], [0], [1], [0, 0, 1, 1], [], []>} : vector<8x128xf32>, vector<128x128xf32>, vector<8x128xf32> -> vector<8x128xf32>
    %c0_21 = arith.constant 0 : index
    %c0_22 = arith.constant 0 : index
    %24 = vector.load %arg9[%c0_21, %c0_22] : memref<1x128xf32, #tpu.memory_space<vmem>>, vector<1x128xf32>
    %25 = vector.broadcast %24 : vector<1x128xf32> to vector<8x128xf32>
    %26 = arith.addf %23, %25 : vector<8x128xf32>
    %c0_23 = arith.constant 0 : index
    %c0_24 = arith.constant 0 : index
    %27 = vector.load %arg10[%c0_23, %c0_24] : memref<8x128xf32, #tpu.memory_space<vmem>>, vector<8x128xf32>
    tpu.vector_store %arg10[%c0_23, %c0_24], %26 {strides = array<i32>} : memref<8x128xf32, #tpu.memory_space<vmem>>, vector<8x128xf32>,
    return
  }
  func.func @transform_0(%arg0: i32) -> (i32, i32) {
    %c0_i32 = arith.constant 0 : i32
    %c0_i32_0 = arith.constant 0 : i32
    return %arg0, %c0_i32 : i32, i32
  }
  func.func @transform_1(%arg0: i32) -> (i32, i32) {
    %c0_i32 = arith.constant 0 : i32
    %c0_i32_0 = arith.constant 0 : i32
    %c0_i32_1 = arith.constant 0 : i32
    return %c0_i32, %c0_i32_0 : i32, i32
  }
  func.func @transform_2(%arg0: i32) -> (i32, i32) {
    %c0_i32 = arith.constant 0 : i32
    %c0_i32_0 = arith.constant 0 : i32
    %c0_i32_1 = arith.constant 0 : i32
    return %c0_i32, %c0_i32_0 : i32, i32
  }
  func.func @transform_3(%arg0: i32) -> (i32, i32) {
    %c0_i32 = arith.constant 0 : i32
    %c0_i32_0 = arith.constant 0 : i32
    %c0_i32_1 = arith.constant 0 : i32
    return %c0_i32, %c0_i32_0 : i32, i32
  }
  func.func @transform_4(%arg0: i32) -> (i32, i32) {
    %c0_i32 = arith.constant 0 : i32
    %c0_i32_0 = arith.constant 0 : i32
    %c0_i32_1 = arith.constant 0 : i32
    return %c0_i32, %c0_i32_0 : i32, i32
  }
  func.func @transform_5(%arg0: i32) -> (i32, i32) {
    %c0_i32 = arith.constant 0 : i32
    %c0_i32_0 = arith.constant 0 : i32
    %c0_i32_1 = arith.constant 0 : i32
    return %c0_i32, %c0_i32_0 : i32, i32
  }
  func.func @transform_6(%arg0: i32) -> (i32, i32) {
    %c0_i32 = arith.constant 0 : i32
    %c0_i32_0 = arith.constant 0 : i32
    %c0_i32_1 = arith.constant 0 : i32
    return %c0_i32, %c0_i32_0 : i32, i32
  }
  func.func @transform_7(%arg0: i32) -> (i32, i32) {
    %c0_i32 = arith.constant 0 : i32
    %c0_i32_0 = arith.constant 0 : i32
    %c0_i32_1 = arith.constant 0 : i32
    return %c0_i32, %c0_i32_0 : i32, i32
  }
  func.func @transform_8(%arg0: i32) -> (i32, i32) {
    %c0_i32 = arith.constant 0 : i32
    %c0_i32_0 = arith.constant 0 : i32
    %c0_i32_1 = arith.constant 0 : i32
    return %c0_i32, %c0_i32_0 : i32, i32
  }
  func.func @transform_9(%arg0: i32) -> (i32, i32) {
    %c0_i32 = arith.constant 0 : i32
    %c0_i32_0 = arith.constant 0 : i32
    return %arg0, %c0_i32 : i32, i32
  }
}

</mosaic_0001>

<bundles_post_ra>
// kernel: tpu_custom_call.1
= control target key start
LH: loop header
LB: loop body
LE: loop exit
PB: predicated region body
PF: predicated region fallthrough
CT: control target
= control target key end

     0   :  { %14 = vsyncpa [#allocation3], 0  ;;  %s1092_s0 = inlined_call_operand.hbm [shape: f32[8,36], index: 0, kind: input, shape index: {}]   ;;  %s1093_s1 = inlined_call_operand.hbm [shape: f32[36,128], index: 1, kind: input, shape index: {}]   ;;  %s1094_s2 = inlined_call_operand.vmem [shape: f32[1,128], index: 2, kind: input, shape index: {}]   ;;  %s1095_s3 = inlined_call_operand.hbm [shape: f32[128,128], index: 3, kind: input, shape index: {}]   ;;  %s1096_s4 = inlined_call_operand.vmem [shape: f32[1,128], index: 4, kind: input, shape index: {}]   ;;  %s1097_s5 = inlined_call_operand.hbm [shape: f32[128,128], index: 5, kind: input, shape index: {}]   ;;  %s1098_s6 = inlined_call_operand.vmem [shape: f32[1,128], index: 6, kind: input, shape index: {}]   ;;  %s1099_s7 = inlined_call_operand.hbm [shape: f32[128,128], index: 7, kind: input, shape index: {}]   ;;  %s1100_s8 = inlined_call_operand.vmem [shape: f32[1,128], index: 8, kind: input, shape index: {}]   ;;  %s1101_s9 = inlined_call_operand.hbm [shape: f32[8,128], index: 9, kind: output, shape index: {}]  }
   0x1   :  { %15 = vsyncpa [#allocation6], 0 }
   0x2   :  { %16 = vsyncpa [#allocation9], 0 }
   0x3   :  { %17 = vsyncpa [#allocation4], 0  ;;  %s900_s30 = smov [#allocation5]   ;;  %s760_s13 = scalar_lea.hbm %s1093_s1, 640 }
   0x4   :  { %s33_s10 = sshll.u32 %s900_s30, 4  ;;  %p761_p0 = scmp.ne.s32.totalorder %s1093_s1, %s760_s13  ;;  %s34_s10 = int_to_ptr.vmem [resolvable:$true] %s33_s10 }
   0x5   :  { %p764_p1 = scmp.lt.u32.totalorder %s760_s13, %s1093_s1 }
   0x7   :  { %p766_p2 = pnand %p764_p1, %p761_p0 }
   0x9   :  { %769 = shalt.err (!%p766_p2)
}
   0xa   :  { %s770_s18 = scalar_lea.vmem %s34_s10, 640  ;;  %p775_p4 = scmp.lt.s32.totalorder %s34_s10, %s34_s10 }
   0xb   :  { %p771_p3 = scmp.ne.s32.totalorder %s34_s10, %s770_s18  ;;  %p776_p5 = scmp.lt.s32.totalorder %s770_s18, %s770_s18 }
   0xd   :  { %p777_p6 = por %p776_p5, %p775_p4 }
   0xf   :  { %p778_p7 = pnand %p777_p6, %p771_p3 }
  0x11   :  { %781 = shalt.err (!%p778_p7)
}
  0x12   :  { %s901_s19 = smov 128   ;;  %s902_s20 = smov 8  }
  0x13   :  { %39 = dma.hbm_to_vmem [thread:$0]  %s1093_s1, 640, %s34_s10, [#allocation6], %s901_s19, %s901_s19, %s902_s20  }
  0x14   :  { %s903_s23 = smov [#allocation8]   ;;  %s904_s25 = smov [#allocation2]  }
  0x15   :  { %s61_s24 = sshll.u32 %s903_s23, 4  ;;  %s24_s26 = sshll.u32 %s904_s25, 4  ;;  %s62_s24 = int_to_ptr.vmem [resolvable:$true] %s61_s24  ;;  %s25_s26 = int_to_ptr.vmem [resolvable:$true] %s24_s26 }
  0x16   :  { %s782_s29 = scalar_lea.hbm %s1097_s5, 2048 }
  0x17   :  { %p783_p8 = scmp.ne.s32.totalorder %s1097_s5, %s782_s29  ;;  %p786_p9 = scmp.lt.u32.totalorder %s782_s29, %s1097_s5 }
  0x19   :  { %p788_p10 = pnand %p786_p9, %p783_p8 }
  0x1b   :  { %791 = shalt.err (!%p788_p10)
}
  0x1c   :  { %s792_s1 = scalar_lea.vmem %s62_s24, 2048  ;;  %p797_p12 = scmp.lt.s32.totalorder %s62_s24, %s62_s24 }
  0x1d   :  { %p793_p11 = scmp.ne.s32.totalorder %s62_s24, %s792_s1  ;;  %p798_p13 = scmp.lt.s32.totalorder %s792_s1, %s792_s1 }
  0x1f   :  { %p799_p0 = por %p798_p13, %p797_p12 }
  0x21   :  { %p800_p1 = pnand %p799_p0, %p793_p11 }
  0x23   :  { %803 = shalt.err (!%p800_p1)
}
  0x24   :  { %67 = dma.hbm_to_vmem [thread:$0]  %s1097_s5, 2048, %s62_s24, [#allocation9], %s901_s19, %s901_s19, %s902_s20  }
  0x25   :  { %s804_s17 = scalar_lea.hbm %s1092_s0, 128 }
  0x26   :  { %p805_p2 = scmp.ne.s32.totalorder %s1092_s0, %s804_s17  ;;  %p808_p3 = scmp.lt.u32.totalorder %s804_s17, %s1092_s0 }
  0x28   :  { %p810_p4 = pnand %p808_p3, %p805_p2 }
  0x2a   :  { %813 = shalt.err (!%p810_p4)
}
  0x2b   :  { %s814_s25 = scalar_lea.vmem %s25_s26, 128  ;;  %p819_p6 = scmp.lt.s32.totalorder %s25_s26, %s25_s26 }
  0x2c   :  { %p815_p5 = scmp.ne.s32.totalorder %s25_s26, %s814_s25  ;;  %p820_p7 = scmp.lt.s32.totalorder %s814_s25, %s814_s25 }
  0x2e   :  { %p821_p8 = por %p820_p7, %p819_p6 }
  0x30   :  { %p822_p9 = pnand %p821_p8, %p815_p5 }
  0x32   :  { %825 = shalt.err (!%p822_p9)
}
  0x33   :  { %27 = dma.hbm_to_vmem [thread:$0]  %s1092_s0, 128, %s25_s26, [#allocation3]  }
  0x34   :  { %s905_s27 = smov [#allocation7]   ;;  %s906_s29 = smov [#allocation10]  }
  0x35   :  { %s47_s28 = sshll.u32 %s905_s27, 4  ;;  %s75_s30 = sshll.u32 %s906_s29, 4  ;;  %s48_s28 = int_to_ptr.vmem [resolvable:$true] %s47_s28  ;;  %s76_s30 = int_to_ptr.vmem [resolvable:$true] %s75_s30 }
  0x36   :  { %s826_s13 = scalar_lea.hbm %s1095_s3, 2048 }
  0x37   :  { %p827_p10 = scmp.ne.s32.totalorder %s1095_s3, %s826_s13  ;;  %p830_p11 = scmp.lt.u32.totalorder %s826_s13, %s1095_s3 }
  0x39   :  { %p832_p12 = pnand %p830_p11, %p827_p10 }
  0x3b   :  { %835 = shalt.err (!%p832_p12)
}
  0x3c   :  { %s836_s0 = scalar_lea.vmem %s48_s28, 2048  ;;  %p841_p0 = scmp.lt.s32.totalorder %s48_s28, %s48_s28 }
  0x3d   :  { %p837_p13 = scmp.ne.s32.totalorder %s48_s28, %s836_s0  ;;  %p842_p1 = scmp.lt.s32.totalorder %s836_s0, %s836_s0 }
  0x3f   :  { %p843_p2 = por %p842_p1, %p841_p0 }
  0x41   :  { %p844_p3 = pnand %p843_p2, %p837_p13 }
  0x43   :  { %847 = shalt.err (!%p844_p3)
}
  0x44   :  { %53 = dma.hbm_to_vmem [thread:$0]  %s1095_s3, 2048, %s48_s28, [#allocation6], %s901_s19, %s901_s19, %s902_s20  }
  0x45   :  { %s848_s21 = scalar_lea.hbm %s1099_s7, 2048 }
  0x46   :  { %p849_p4 = scmp.ne.s32.totalorder %s1099_s7, %s848_s21  ;;  %p852_p5 = scmp.lt.u32.totalorder %s848_s21, %s1099_s7 }
  0x48   :  { %p854_p6 = pnand %p852_p5, %p849_p4 }
  0x4a   :  { %857 = shalt.err (!%p854_p6)
}
  0x4b   :  { %s858_s24 = scalar_lea.vmem %s76_s30, 2048  ;;  %p863_p8 = scmp.lt.s32.totalorder %s76_s30, %s76_s30 }
  0x4c   :  { %p859_p7 = scmp.ne.s32.totalorder %s76_s30, %s858_s24  ;;  %p864_p9 = scmp.lt.s32.totalorder %s858_s24, %s858_s24 }
  0x4e   :  { %p865_p10 = por %p864_p9, %p863_p8 }
  0x50   :  { %p866_p11 = pnand %p865_p10, %p859_p7 }
  0x52   :  { %869 = shalt.err (!%p866_p11)
}
  0x53   :  { %81 = dma.hbm_to_vmem [thread:$0]  %s1099_s7, 2048, %s76_s30, [#allocation9], %s901_s19, %s901_s19, %s902_s20  }
  0x54   :  { %892 = dma.done.wait [#allocation3], 128  }
  0x55   :  { %893 = vsyncadd [#allocation3], 4294967168 }
  0x56   :  { %894 = dma.done.wait [#allocation6], 2688  }
  0x57   :  { %895 = vsyncadd [#allocation6], 4294964608 }
  0x58   :  { %896 = dma.done.wait [#allocation9], 4096  }
  0x59   :  { %897 = vsyncadd [#allocation9], 4294963200  ;;  %v907_v0 = vmov 0.0|0.0   ;;  %vm908_vm0 = vmmov 0   ;;  %v909_v1 = vmov 0.0   ;;  %v100_v2 = vld [vmem:[#allocation5] sm:$0xff] }
  0x5a   :  { %671 = vmatprep.subr.bf16.mxu0 %v907_v0  ;;  %563 = vmatprep.mubr.msk.f32.mxu0 %vm908_vm0, %v909_v1  ;;  %v101_v3 = vld [vmem:[#allocation5 + $0x8] sm:$0xff]  ;;  %v102_v4 = vld [vmem:[#allocation5 + $0x10] sm:$0xff]  ;;  %v103_v6 = vld [vmem:[#allocation5 + $0x18] sm:$0xff]  ;;  %vm116_vm1 = vcmask 1043456   ;;  %vm112_vm2 = vcmask 293888   ;;  %s910_s11 = smov [#allocation11]  }
  0x5b   :  { %677 = vmatprep.subr.bf16.mxu1 %v907_v0  ;;  %598 = vmatprep.mubr.msk.f32.mxu1 %vm908_vm0, %v909_v1  ;;  %v672_v5 = vpack.c.bf16 %v101_v3, %v100_v2  ;;  %v191_v7 = vld [vmem:[#allocation7] sm:$0xff]  ;;  %v192_v8 = vld [vmem:[#allocation7 + $0x8] sm:$0xff]  ;;  %v193_v9 = vld [vmem:[#allocation7 + $0x10] sm:$0xff]  ;;  %v675_v10 = vpack.c.bf16 %v103_v6, %v102_v4  ;;  %s479_s12 = sshll.u32 %s910_s11, 4  ;;  %s480_s12 = int_to_ptr.vmem [resolvable:$true] %s479_s12 }
  0x5c   :  { %v678_v11 = vpack.c.bf16 %v192_v8, %v191_v7  ;;  %v194_v12 = vld [vmem:[#allocation7 + $0x18] sm:$0xff]  ;;  %v195_v14 = vld [vmem:[#allocation7 + $0x20] sm:$0xff]  ;;  %v196_v15 = vld [vmem:[#allocation7 + $0x28] sm:$0xff]  ;;  %s870_s13 = scalar_lea.vmem %s480_s12, 128  ;;  %p875_p13 = scmp.lt.s32.totalorder %s480_s12, %s480_s12 }
  0x5d   :  { %673 = vmatpush3.bf16.msra.mxu0 %v672_v5  ;;  %v681_v13 = vpack.c.bf16 %v194_v12, %v193_v9  ;;  %v104_v16 = vld [vmem:[#allocation5 + $0x20] sm:$0xf]  ;;  %v99_v17 = vld [vmem:[#allocation2] sm:$0xff]  ;;  %v684_v18 = vpack.c.bf16 %v196_v15, %v195_v14  ;;  %v199_v22 = vld [vmem:[#allocation7 + $0x40] sm:$0xff]  ;;  %p871_p12 = scmp.ne.s32.totalorder %s480_s12, %s870_s13  ;;  %p876_p0 = scmp.lt.s32.totalorder %s870_s13, %s870_s13 }
  0x5e   :  { %674 = vmatprep.subr.bf16.mxu0 %v907_v0  ;;  %679 = vmatpush3.bf16.msra.mxu1 %v678_v11  ;;  %v197_v19 = vld [vmem:[#allocation7 + $0x30] sm:$0xff]  ;;  %v198_v20 = vld [vmem:[#allocation7 + $0x38] sm:$0xff]  ;;  %v200_v23 = vld [vmem:[#allocation7 + $0x48] sm:$0xff] }
  0x5f   :  { %680 = vmatprep.subr.bf16.mxu1 %v907_v0  ;;  %v687_v21 = vpack.c.bf16 %v198_v20, %v197_v19  ;;  %v690_v24 = vpack.c.bf16 %v200_v23, %v199_v22  ;;  %v201_v25 = vld [vmem:[#allocation7 + $0x50] sm:$0xff]  ;;  %v202_v26 = vld [vmem:[#allocation7 + $0x58] sm:$0xff]  ;;  %v203_v28 = vld [vmem:[#allocation7 + $0x60] sm:$0xff]  ;;  %p877_p1 = por %p876_p0, %p875_p13 }
  0x60   :  { %v693_v27 = vpack.c.bf16 %v202_v26, %v201_v25  ;;  %v204_v29 = vld [vmem:[#allocation7 + $0x68] sm:$0xff]  ;;  %v205_v31 = vld [vmem:[#allocation7 + $0x70] sm:$0xff]  ;;  %v206_v32 = vld [vmem:[#allocation7 + $0x78] sm:$0xff] }
  0x61   :  { %676 = vmatpush3.bf16.msra.mxu0 %v675_v10  ;;  %v696_v30 = vpack.c.bf16 %v204_v29, %v203_v28  ;;  %v699_v33 = vpack.c.bf16 %v206_v32, %v205_v31  ;;  %v285_v34 = vld [vmem:[#allocation8] sm:$0xff]  ;;  %v286_v35 = vld [vmem:[#allocation8 + $0x8] sm:$0xff]  ;;  %v287_v36 = vld [vmem:[#allocation8 + $0x10] sm:$0xff]  ;;  %p878_p2 = pnand %p877_p1, %p871_p12 }
  0x62   :  { %561 = vmatprep.subr.mxu0 %v909_v1  ;;  %682 = vmatpush3.bf16.msra.mxu1 %v681_v13  ;;  %v702_v37 = vpack.c.bf16 %v286_v35, %v285_v34  ;;  %v288_v38 = vld [vmem:[#allocation8 + $0x18] sm:$0xff]  ;;  %v289_v40 = vld [vmem:[#allocation8 + $0x20] sm:$0xff]  ;;  %v290_v41 = vld [vmem:[#allocation8 + $0x28] sm:$0xff] }
  0x63   :  { %683 = vmatprep.subr.bf16.mxu1 %v907_v0  ;;  %v705_v39 = vpack.c.bf16 %v288_v38, %v287_v36  ;;  %v708_v42 = vpack.c.bf16 %v290_v41, %v289_v40  ;;  %v291_v43 = vld [vmem:[#allocation8 + $0x30] sm:$0xff]  ;;  %v292_v44 = vld [vmem:[#allocation8 + $0x38] sm:$0xff]  ;;  %v293_v46 = vld [vmem:[#allocation8 + $0x40] sm:$0xff] }
  0x64   :  { %v711_v45 = vpack.c.bf16 %v292_v44, %v291_v43  ;;  %v294_v47 = vld [vmem:[#allocation8 + $0x48] sm:$0xff]  ;;  %v295_v49 = vld [vmem:[#allocation8 + $0x50] sm:$0xff]  ;;  %v296_v50 = vld [vmem:[#allocation8 + $0x58] sm:$0xff] }
  0x65   :  { %562 = vmatpush3.msk.msra.mxu0 %vm116_vm1, %v104_v16  ;;  %v714_v48 = vpack.c.bf16 %v294_v47, %v293_v46  ;;  %v717_v51 = vpack.c.bf16 %v296_v50, %v295_v49  ;;  %v297_v52 = vld [vmem:[#allocation8 + $0x60] sm:$0xff]  ;;  %v298_v53 = vld [vmem:[#allocation8 + $0x68] sm:$0xff]  ;;  %v490_v55 = vld [vmem:[%s1094_s2] ss:$0 sm:$0xff] }
  0x66   :  { %564 = vmatmul.mubr.msk.f32.vlgmr.msra.gmra.mrb[0].mxu0 %vm112_vm2, %v99_v17  ;;  %701 = vmatprep.subr.bf16.mxu0 %v907_v0  ;;  %v720_v54 = vpack.c.bf16 %v298_v53, %v297_v52  ;;  %v299_v60 = vld [vmem:[#allocation8 + $0x70] sm:$0xff]  ;;  %v300_v61 = vld [vmem:[#allocation8 + $0x78] sm:$0xff]  ;;  %v379_v63 = vld [vmem:[#allocation10] sm:$0xff] }
  0x67   :  { %685 = vmatpush3.bf16.msra.mxu1 %v684_v18  ;;  %633 = vmatprep.mubr.msk.f32.mxu0 %vm908_vm0, %v909_v1  ;;  %v723_v62 = vpack.c.bf16 %v300_v61, %v299_v60  ;;  %v380_v2 = vld [vmem:[#allocation10 + $0x8] sm:$0xff]  ;;  %v381_v3 = vld [vmem:[#allocation10 + $0x10] sm:$0xff]  ;;  %v382_v5 = vld [vmem:[#allocation10 + $0x18] sm:$0xff] }
  0x68   :  { %686 = vmatprep.subr.bf16.mxu1 %v907_v0  ;;  %703 = vmatpush3.bf16.msra.mxu0 %v702_v37  ;;  %v726_v4 = vpack.c.bf16 %v380_v2, %v379_v63  ;;  %v729_v6 = vpack.c.bf16 %v382_v5, %v381_v3  ;;  %v383_v7 = vld [vmem:[#allocation10 + $0x20] sm:$0xff]  ;;  %v384_v8 = vld [vmem:[#allocation10 + $0x28] sm:$0xff]  ;;  %v386_v10 = vld [vmem:[#allocation10 + $0x38] sm:$0xff] }
  0x69   :  { %704 = vmatprep.subr.bf16.mxu0 %v907_v0  ;;  %v732_v9 = vpack.c.bf16 %v384_v8, %v383_v7  ;;  %v387_v12 = vld [vmem:[#allocation10 + $0x40] sm:$0xff]  ;;  %v388_v13 = vld [vmem:[#allocation10 + $0x48] sm:$0xff]  ;;  %v389_v15 = vld [vmem:[#allocation10 + $0x50] sm:$0xff] }
  0x6a   :  { %v738_v14 = vpack.c.bf16 %v388_v13, %v387_v12  ;;  %v390_v16 = vld [vmem:[#allocation10 + $0x58] sm:$0xff]  ;;  %v391_v18 = vld [vmem:[#allocation10 + $0x60] sm:$0xff]  ;;  %v392_v19 = vld [vmem:[#allocation10 + $0x68] sm:$0xff] }
  0x6b   :  { %688 = vmatpush3.bf16.msra.mxu1 %v687_v21  ;;  %v741_v17 = vpack.c.bf16 %v390_v16, %v389_v15  ;;  %v744_v20 = vpack.c.bf16 %v392_v19, %v391_v18  ;;  %v493_v21 = vld [vmem:[%s1096_s4] ss:$0 sm:$0xff] }
  0x6c   :  { %689 = vmatprep.subr.bf16.mxu1 %v907_v0  ;;  %706 = vmatpush3.bf16.msra.mxu0 %v705_v39  ;;  %v393_v26 = vld [vmem:[#allocation10 + $0x70] sm:$0xff] }
  0x6d   :  { %707 = vmatprep.subr.bf16.mxu0 %v907_v0  ;;  %v494_v29 = vld [vmem:[%s1098_s6] ss:$0 sm:$0xff] }
  0x6f   :  { %691 = vmatpush3.bf16.msra.mxu1 %v690_v24 }
  0x70   :  { %692 = vmatprep.subr.bf16.mxu1 %v907_v0  ;;  %709 = vmatpush3.bf16.msra.mxu0 %v708_v42 }
  0x71   :  { %710 = vmatprep.subr.bf16.mxu0 %v907_v0 }
  0x73   :  { %694 = vmatpush3.bf16.msra.mxu1 %v693_v27  ;;  %v394_v27 = vld [vmem:[#allocation10 + $0x78] sm:$0xff] }
  0x74   :  { %695 = vmatprep.subr.bf16.mxu1 %v907_v0  ;;  %712 = vmatpush3.bf16.msra.mxu0 %v711_v45  ;;  %v747_v28 = vpack.c.bf16 %v394_v27, %v393_v26 }
  0x75   :  { %713 = vmatprep.subr.bf16.mxu0 %v907_v0 }
  0x77   :  { %697 = vmatpush3.bf16.msra.mxu1 %v696_v30 }
  0x78   :  { %698 = vmatprep.subr.bf16.mxu1 %v907_v0  ;;  %715 = vmatpush3.bf16.msra.mxu0 %v714_v48 }
  0x79   :  { %716 = vmatprep.subr.bf16.mxu0 %v907_v0 }
  0x7b   :  { %700 = vmatpush3.bf16.msra.mxu1 %v699_v33  ;;  %v495_v33 = vld [vmem:[%s1100_s8] ss:$0 sm:$0xff] }
  0x7c   :  { %725 = vmatprep.subr.bf16.mxu1 %v907_v0  ;;  %718 = vmatpush3.bf16.msra.mxu0 %v717_v51 }
  0x7d   :  { %719 = vmatprep.subr.bf16.mxu0 %v907_v0 }
  0x80   :  { %721 = vmatpush3.bf16.msra.mxu0 %v720_v54 }
  0x81   :  { %722 = vmatprep.subr.bf16.mxu0 %v907_v0 }
  0x84   :  { %724 = vmatpush3.bf16.msra.mxu0 %v723_v62 }
 0x139   :  { %v186_v56 = vpop.f32.mrb[0].mxu0 }
 0x13a   :  { %v187_v57 = vadd.f32 %v490_v55, %v186_v56  ;;  %v565_v58 = vpop.f32.mrb[1].mxu0 }
 0x13c   :  { %v190_v59 = vmax.f32 %v187_v57, 0.0 }
 0x13e   :  { %599 = vmatmul.mubr.f32.vlgmr.msra.gmra.mrb[0].mxu1 %v190_v59 }
 0x13f   :  { %668 = vmatprep.mubr.msk.f32.mxu1 %vm908_vm0, %v909_v1  ;;  %727 = vmatpush3.bf16.msra.mxu1 %v726_v4  ;;  %v385_v1 = vld [vmem:[#allocation10 + $0x30] sm:$0xff] }
 0x140   :  { %728 = vmatprep.subr.bf16.mxu1 %v907_v0  ;;  %v735_v11 = vpack.c.bf16 %v386_v10, %v385_v1 }
 0x143   :  { %730 = vmatpush3.bf16.msra.mxu1 %v729_v6 }
 0x144   :  { %731 = vmatprep.subr.bf16.mxu1 %v907_v0 }
 0x147   :  { %733 = vmatpush3.bf16.msra.mxu1 %v732_v9 }
 0x148   :  { %734 = vmatprep.subr.bf16.mxu1 %v907_v0 }
 0x14b   :  { %736 = vmatpush3.bf16.msra.mxu1 %v735_v11 }
 0x14c   :  { %737 = vmatprep.subr.bf16.mxu1 %v907_v0 }
 0x14f   :  { %739 = vmatpush3.bf16.msra.mxu1 %v738_v14 }
 0x150   :  { %740 = vmatprep.subr.bf16.mxu1 %v907_v0 }
 0x153   :  { %742 = vmatpush3.bf16.msra.mxu1 %v741_v17 }
 0x154   :  { %743 = vmatprep.subr.bf16.mxu1 %v907_v0 }
 0x157   :  { %745 = vmatpush3.bf16.msra.mxu1 %v744_v20 }
 0x158   :  { %746 = vmatprep.subr.bf16.mxu1 %v907_v0 }
 0x15b   :  { %748 = vmatpush3.bf16.msra.mxu1 %v747_v28 }
 0x211   :  { %v280_v22 = vpop.f32.mrb[0].mxu1 }
 0x212   :  { %v281_v23 = vadd.f32 %v493_v21, %v280_v22  ;;  %v600_v24 = vpop.f32.mrb[1].mxu1 }
 0x214   :  { %v284_v25 = vmax.f32 %v281_v23, 0.0 }
 0x216   :  { %634 = vmatmul.mubr.f32.vlgmr.msra.gmra.mrb[2].mxu0 %v284_v25 }
 0x2e9   :  { %v374_v30 = vpop.f32.mrb[2].mxu0 }
 0x2ea   :  { %v375_v31 = vadd.f32 %v494_v29, %v374_v30  ;;  %v635_v0 = vpop.f32.mrb[3].mxu0 }
 0x2ec   :  { %v378_v32 = vmax.f32 %v375_v31, 0.0 }
 0x2ee   :  { %669 = vmatmul.mubr.f32.vlgmr.msra.gmra.mrb[2].mxu1 %v378_v32 }
 0x3c1   :  { %v468_v34 = vpop.f32.mrb[2].mxu1 }
 0x3c2   :  { %v469_v35 = vadd.f32 %v495_v33, %v468_v34  ;;  %v670_v36 = vpop.f32.mrb[3].mxu1 }
 0x3c4   :  { %472 = vst [vmem:[#allocation11] sm:$0xff] %v469_v35 }
 0x3c5   :  { %881 = shalt.err (!%p878_p2)
}
 0x3c6   :  { %s882_s10 = scalar_lea.hbm %s1101_s9, 128 }
 0x3c7   :  { %p883_p3 = scmp.ne.s32.totalorder %s1101_s9, %s882_s10  ;;  %p886_p4 = scmp.lt.u32.totalorder %s882_s10, %s1101_s9 }
 0x3c9   :  { %p888_p5 = pnand %p886_p4, %p883_p3 }
 0x3cb   :  { %891 = shalt.err (!%p888_p5)
}
 0x3cc   :  { %482 = dma.vmem_to_hbm [thread:$0]  %s480_s12, 128, %s1101_s9, [#allocation4]  }
 0x3cd   :  { %898 = dma.done.wait [#allocation4], 128  }
 0x3ce   :  { %899 = vsyncadd [#allocation4], 4294967168 }
 0x3cf   :  { %486 = vsyncpa [#allocation3], 1 }
 0x3d0   :  { %487 = vsyncpa [#allocation6], 1 }
 0x3d1   :  { %488 = vsyncpa [#allocation9], 1 }
 0x3d2   :  { %489 = vsyncpa [#allocation4], 1 }

</bundles_post_ra>
